<compile_context>
chip_gen: v6e
topology: v6e:2x2x1
jax: 0.10.0
libtpu: 0.0.40
codegen_flags: <defaults>
</compile_context>

<pallas_src>
import jax
import jax.numpy as jnp
from jax.experimental import pallas as pl
from jax.experimental.pallas import tpu as pltpu


def _round_up(n, m):
    return ((n + m - 1) // m) * m


def _pick_tile(total, max_tile, align):
    """Largest multiple of `align` <= max_tile that divides `total`
    (`total` is itself a multiple of `align`)."""
    best = align
    t = align
    limit = min(max_tile, total)
    while t <= limit:
        if total % t == 0:
            best = t
        t += align
    return best


def _skip_linear_kernel(x_ref, w_ref, b_ref, o_ref, acc_ref):
    # grid = (j over K tiles, i over batch tiles, k over F tiles); k innermost.
    # out[i, j] = sum_k x[i, k] @ W_aug[k, j] + bias[j]
    # W_aug already contains the identity skip, so this IS the full forward.
    k = pl.program_id(2)

    @pl.when(k == 0)
    def _():
        acc_ref[...] = jnp.zeros_like(acc_ref)

    acc_ref[...] += jnp.dot(x_ref[...], w_ref[...],
                            preferred_element_type=jnp.float32)

    @pl.when(k == pl.num_programs(2) - 1)
    def _():
        o_ref[...] = (acc_ref[...]
                      + b_ref[...].astype(jnp.float32)).astype(o_ref.dtype)


def prepare_skip_linear_params(w, b):
    """Fold the zero-padded identity skip into the weights and pad them to
    lane/sublane-friendly shapes.  Call ONCE when weights are set (not per
    forward) -- it reads and rewrites the full weight matrix.

    W_aug = W + eye(F, K)   (eye(F, K) == [I_F | 0] since K >= F)
    """
    F, K = w.shape
    assert K >= F, "padding_size must be >= 0 (same constraint as the PyTorch ref)"
    F_pad = _round_up(F, 128)
    K_pad = _round_up(K, 128)
    w_aug = (w.astype(jnp.float32) + jnp.eye(F, K, dtype=jnp.float32)).astype(w.dtype)
    # Zero rows / cols contribute nothing to the matmul: padding is free.
    w_p = jnp.pad(w_aug, ((0, F_pad - F), (0, K_pad - K)))
    b_p = jnp.pad(b.reshape(1, K), ((0, 0), (0, K_pad - K)))
    return w_p, b_p


def skip_linear_forward(x, w_p, b_p, out_features, *,
                        batch_tile=256, k_tile=512, f_tile=512):
    """SkipConnectionModule(Linear(F, K)) forward: (x @ W + b) + zero_pad(x).

    `w_p`, `b_p` must come from `prepare_skip_linear_params`.
    """
    B, F = x.shape
    F_pad, K_pad = w_p.shape
    K = out_features
    assert b_p.shape == (1, K_pad)
    assert F_pad == _round_up(F, 128) and K_pad == _round_up(K, 128)
    assert batch_tile % 16 == 0 and k_tile % 128 == 0 and f_tile % 128 == 0

    # ---- Pad x along F only (zeros are harmless).  Batch stays ragged: the
    # grid uses cdiv(B, tm) and the partial last output block is masked on
    # store, so no padded copy of x along the batch axis is materialized.
    x_p = x if F_pad == F else jnp.pad(x, ((0, 0), (0, F_pad - F)))

    # ---- Tile selection.
    sublane = 16 if x.dtype.itemsize < 4 else 8      # bf16 needs 16-row tiles
    tm = min(batch_tile, _round_up(B, sublane))
    tn = _pick_tile(K_pad, k_tile, 128)
    tf = _pick_tile(F_pad, f_tile, 128)

    # Ensure >= 2 parallel grid blocks where possible so v7x's two
    # TensorCores both get work (no-op if the problem cannot be split).
    def n_parallel(tm_, tn_):
        return (K_pad // tn_) * pl.cdiv(B, tm_)

    while n_parallel(tm, tn) < 2:
        if tm >= 2 * sublane and pl.cdiv(B, tm // 2) > pl.cdiv(B, tm):
            tm //= 2
        elif tn % 256 == 0:
            tn //= 2
        else:
            break

    n_j = K_pad // tn
    n_i = pl.cdiv(B, tm)
    n_k = F_pad // tf
    grid = (n_j, n_i, n_k)

    # ---- Explicit VMEM budget (double-buffered operands + f32 accumulator),
    # capped at the v7x physical 64 MiB ceiling.
    vmem_needed = (2 * tm * tf * x_p.dtype.itemsize
                   + 2 * tf * tn * w_p.dtype.itemsize
                   + 2 * tn * b_p.dtype.itemsize
                   + 2 * tm * tn * x.dtype.itemsize
                   + tm * tn * 4)
    vmem_limit = int(min(64 * 1024 * 1024,
                         max(2 * vmem_needed, 16 * 1024 * 1024)))

    # With n_k == 1 the W/bias block index is constant across the inner batch
    # axis -> Pallas fetches W exactly once; otherwise W streams once per
    # batch tile (the reduction axis must stay innermost for the accumulator).
    w_streams = 1 if n_k == 1 else n_i
    cost = pl.CostEstimate(
        flops=2 * (n_i * tm) * F_pad * K_pad,
        transcendentals=0,
        bytes_accessed=int(n_j * x_p.size * x_p.dtype.itemsize
                           + w_streams * w_p.size * w_p.dtype.itemsize
                           + b_p.size * b_p.dtype.itemsize
                           + B * K_pad * x.dtype.itemsize),
    )

    out = pl.pallas_call(
        _skip_linear_kernel,
        out_shape=jax.ShapeDtypeStruct((B, K_pad), x.dtype),
        grid_spec=pltpu.PrefetchScalarGridSpec(
            num_scalar_prefetch=0,
            grid=grid,
            in_specs=[
                pl.BlockSpec((tm, tf), lambda j, i, k: (i, k)),   # x batch/F tile
                pl.BlockSpec((tf, tn), lambda j, i, k: (k, j)),   # W_aug (resident when n_k == 1)
                pl.BlockSpec((1, tn), lambda j, i, k: (0, j)),    # bias column tile
            ],
            out_specs=pl.BlockSpec((tm, tn), lambda j, i, k: (i, j)),
            scratch_shapes=[pltpu.VMEM((tm, tn), jnp.float32)],
        ),
        compiler_params=pltpu.CompilerParams(
            dimension_semantics=("parallel", "parallel", "arbitrary"),
            vmem_limit_bytes=vmem_limit,
        ),
        cost_estimate=cost,
    )(x_p, w_p, b_p)

    return out[:, :K]


def _reference(x, w, b):
    out = x @ w + b
    pad = out.shape[1] - x.shape[1]
    x_pad = jnp.pad(x, ((0, 0), (0, pad)))
    return out + x_pad


if __name__ == "__main__":
    B, F, K = 16, 32, 64  # batch, in_features, out_features (K > F triggers padding)
    key = jax.random.PRNGKey(0)
    kx, kw, kb = jax.random.split(key, 3)

    x = jax.random.normal(kx, (B, F), dtype=jnp.float32)
    # Deterministic synthetic Linear(F, K) parameters.
    w = jax.random.normal(kw, (F, K), dtype=jnp.float32) * (1.0 / jnp.sqrt(F))
    b = jax.random.normal(kb, (K,), dtype=jnp.float32) * 0.01

    # Weight preparation is hoisted out of the per-call path (do once).
    w_p, b_p = prepare_skip_linear_params(w, b)

    out = skip_linear_forward(x, w_p, b_p, out_features=K)
    out = jax.block_until_ready(out)

    ref = _reference(x, w, b)
    assert out.shape == (B, K)
    assert jnp.allclose(out, ref, atol=1e-4, rtol=1e-4), "mismatch vs reference"
    print("KERNEL_OK")
</pallas_src>

<mosaic_0001>
module attributes {stable_mosaic.version = 11 : i64} {
  func.func @_skip_linear_kernel(%arg0: i32, %arg1: i32, %arg2: i32, %arg3: memref<8x128xf32, #tpu.memory_space<vmem>>, %arg4: memref<128x128xf32, #tpu.memory_space<vmem>>, %arg5: memref<1x128xf32, #tpu.memory_space<vmem>>, %arg6: memref<8x128xf32, #tpu.memory_space<vmem>>, %arg7: memref<8x128xf32, #tpu.memory_space<vmem>>) attributes {dimension_semantics = [#tpu.dimension_semantics<parallel>, #tpu.dimension_semantics<parallel>, #tpu.dimension_semantics<arbitrary>], iteration_bounds = array<i64: 1, 2, 1>, scalar_prefetch = 0 : i64, scratch_operands = 1 : i64, tpu.core_type = #tpu.core_type<tc>, window_params = [{transform_indices = @transform_0, window_bounds = array<i64: 8, 128>}, {transform_indices = @transform_1, window_bounds = array<i64: 128, 128>}, {transform_indices = @transform_2, window_bounds = array<i64: 1, 128>}, {transform_indices = @transform_3, window_bounds = array<i64: 8, 128>}]} {
    %c0_i32 = arith.constant 0 : i32
    %0 = arith.cmpi eq, %arg2, %c0_i32 : i32
    %1 = arith.extui %0 : i1 to i32
    %c0_i32_0 = arith.constant 0 : i32
    %2 = arith.cmpi ne, %1, %c0_i32_0 : i32
    scf.if %2 {
      %cst_10 = arith.constant 0.000000e+00 : f32
      %12 = vector.broadcast %cst_10 : f32 to vector<8x128xf32>
      %c0_11 = arith.constant 0 : index
      %c0_12 = arith.constant 0 : index
      %13 = vector.load %arg7[%c0_11, %c0_12] : memref<8x128xf32, #tpu.memory_space<vmem>>, vector<8x128xf32>
      tpu.vector_store %arg7[%c0_11, %c0_12], %12 {strides = array<i32>} : memref<8x128xf32, #tpu.memory_space<vmem>>, vector<8x128xf32>,
    } else {
    }
    %c0 = arith.constant 0 : index
    %c0_1 = arith.constant 0 : index
    %3 = vector.load %arg7[%c0, %c0_1] : memref<8x128xf32, #tpu.memory_space<vmem>>, vector<8x128xf32>
    %c0_2 = arith.constant 0 : index
    %c0_3 = arith.constant 0 : index
    %4 = vector.load %arg3[%c0_2, %c0_3] : memref<8x128xf32, #tpu.memory_space<vmem>>, vector<8x128xf32>
    %c0_4 = arith.constant 0 : index
    %c0_5 = arith.constant 0 : index
    %5 = vector.load %arg4[%c0_4, %c0_5] : memref<128x128xf32, #tpu.memory_space<vmem>>, vector<128x128xf32>
    %cst = arith.constant dense<0.000000e+00> : vector<8x128xf32>
    %6 = tpu.matmul %4, %5, %cst {dimension_numbers = #tpu.dot_dimension_numbers<[1], [0], [0], [1], [0, 0, 1, 1], [], []>} : vector<8x128xf32>, vector<128x128xf32>, vector<8x128xf32> -> vector<8x128xf32>
    %7 = arith.addf %3, %6 : vector<8x128xf32>
    %c0_6 = arith.constant 0 : index
    %c0_7 = arith.constant 0 : index
    %8 = vector.load %arg7[%c0_6, %c0_7] : memref<8x128xf32, #tpu.memory_space<vmem>>, vector<8x128xf32>
    tpu.vector_store %arg7[%c0_6, %c0_7], %7 {strides = array<i32>} : memref<8x128xf32, #tpu.memory_space<vmem>>, vector<8x128xf32>,
    %c0_i32_8 = arith.constant 0 : i32
    %9 = arith.cmpi eq, %arg2, %c0_i32_8 : i32
    %10 = arith.extui %9 : i1 to i32
    %c0_i32_9 = arith.constant 0 : i32
    %11 = arith.cmpi ne, %10, %c0_i32_9 : i32
    scf.if %11 {
      %c0_10 = arith.constant 0 : index
      %c0_11 = arith.constant 0 : index
      %12 = vector.load %arg7[%c0_10, %c0_11] : memref<8x128xf32, #tpu.memory_space<vmem>>, vector<8x128xf32>
      %c0_12 = arith.constant 0 : index
      %c0_13 = arith.constant 0 : index
      %13 = vector.load %arg5[%c0_12, %c0_13] : memref<1x128xf32, #tpu.memory_space<vmem>>, vector<1x128xf32>
      %14 = vector.broadcast %13 : vector<1x128xf32> to vector<8x128xf32>
      %15 = arith.addf %12, %14 : vector<8x128xf32>
      %c0_14 = arith.constant 0 : index
      %c0_15 = arith.constant 0 : index
      %16 = vector.load %arg6[%c0_14, %c0_15] : memref<8x128xf32, #tpu.memory_space<vmem>>, vector<8x128xf32>
      tpu.vector_store %arg6[%c0_14, %c0_15], %15 {strides = array<i32>} : memref<8x128xf32, #tpu.memory_space<vmem>>, vector<8x128xf32>,
    } else {
    }
    return
  }
  func.func @transform_0(%arg0: i32, %arg1: i32, %arg2: i32) -> (i32, i32) {
    %c0_i32 = arith.constant 0 : i32
    return %arg1, %arg2 : i32, i32
  }
  func.func @transform_1(%arg0: i32, %arg1: i32, %arg2: i32) -> (i32, i32) {
    %c0_i32 = arith.constant 0 : i32
    return %arg2, %arg0 : i32, i32
  }
  func.func @transform_2(%arg0: i32, %arg1: i32, %arg2: i32) -> (i32, i32) {
    %c0_i32 = arith.constant 0 : i32
    %c0_i32_0 = arith.constant 0 : i32
    return %c0_i32, %arg0 : i32, i32
  }
  func.func @transform_3(%arg0: i32, %arg1: i32, %arg2: i32) -> (i32, i32) {
    %c0_i32 = arith.constant 0 : i32
    return %arg1, %arg0 : i32, i32
  }
}

</mosaic_0001>

<bundles_post_ra>
// kernel: tpu_custom_call.1
= control target key start
LH: loop header
LB: loop body
LE: loop exit
PB: predicated region body
PF: predicated region fallthrough
CT: control target
= control target key end

     0   :  { %8 = vsyncpa [#allocation4], 0  ;;  %s979_s0 = inlined_call_operand.hbm [shape: f32[16,128], index: 0, kind: input, shape index: {}]   ;;  %s980_s1 = inlined_call_operand.hbm [shape: f32[128,128], index: 1, kind: input, shape index: {}]   ;;  %s981_s2 = inlined_call_operand.vmem [shape: f32[1,128], index: 2, kind: input, shape index: {}]   ;;  %s982_s3 = inlined_call_operand.hbm [shape: f32[16,128], index: 3, kind: output, shape index: {}]  }
   0x1   :  { %10 = vsyncpa [#allocation4 + $0x1], 0 }
   0x2   :  { %11 = vsyncpa [#allocation7], 0 }
   0x3   :  { %12 = vsyncpa [#allocation5], 0 }
   0x4   :  { %14 = vsyncpa [#allocation5 + $0x1], 0  ;;  %s796_s12 = smov 0   ;;  %s798_s13 = smov 0  }
   0x5   :  { %s800_s14 = smov 0   ;;  %s802_s15 = smov 0  }
   0x6   :  { %s804_s16 = smov 0   ;;  %s806_s17 = smov 0  }
   0x7 LB: > { %s483_s18 = sadd.s32 4294967295, %s767_s17   ;;  %s484_s19 = sadd.s32 4294967294, %s767_s17   ;;  %s767_s17 = sphi %s806_s17, %s20_s17   ;;  %s763_s16 = sphi %s804_s16, %s1000_s16   ;;  %s759_s15 = sphi %s802_s15, %s999_s15   ;;  %s755_s14 = sphi %s800_s14, %s998_s14   ;;  %s751_s13 = sphi %s798_s13, %s997_s13   ;;  %s747_s12 = sphi %s796_s12, %s996_s12  }
   0x8   : > { %p61_p0 = scmp.ne.s32.totalorder %s751_s13, %s747_s12  ;;  %p830_p1 = scmp.eq.s32.totalorder %s483_s18, 0 }
   0x9   : > { %p834_p2 = scmp.eq.s32.totalorder %s483_s18, 1  ;;  %p147_p3 = scmp.eq.s32.totalorder %s484_s19, 1 }
   0xa   : > { %p840_p4 = por %p830_p1, %p61_p0  ;;  %p485_p5 = scmp.ge.s32.totalorder %s767_s17, 1 }
   0xb   : > { %p845_p6 = por %p147_p3, %p61_p0  ;;  %p154_p7 = scmp.lt.s32.totalorder %s767_s17, 3 }
   0xc   : > { %s986_s22 = scalar_select %p840_p4, 1, 0 }
   0xd   : > { %s987_s23 = scalar_select %p845_p6, 1, 0 }
   0xe   : > { %p850_p8 = pnand %p485_p5, %p154_p7  ;;  %s769_s25 = smov [#allocation6]  }
   0xf   : > { %s170_s26 = sshll.u32 %s769_s25, 4  ;;  %s35_s28 = sadd.s32 1, %s763_s16  ;;  %s171_s26 = int_to_ptr.vmem [resolvable:$true] %s170_s26 }
  0x10   : > { %p560_p9 = pneg %p850_p8  ;;  %s640_s29 = scalar_lea.vmem %s171_s26, 2048 }
  0x11   : > { %p641_p13 = scmp.ne.s32.totalorder %s171_s26, %s640_s29  ;;  %p648_p5 = scmp.lt.s32.totalorder %s171_s26, %s171_s26 }
  0x12   : > { %p859_p11 = pnand %p560_p9, %p830_p1  ;;  %p649_p7 = scmp.lt.s32.totalorder %s640_s29, %s640_s29 }
  0x14   : > { %p631_p12 = pneg %p859_p11  ;;  %p650_p6 = por %p649_p7, %p648_p5 }
  0x16   : > { %p643_p0 = pnand %p641_p13, %p631_p12 }
  0x18   : > { %p644_p3 = pneg %p643_p0 }
  0x1a   : > { %p651_p4 = pnand %p650_p6, %p644_p3 }
  0x1c   : > { %654 = shalt.err (!%p651_p4)
}
  0x1d   : > { %s770_s30 = smov 128   ;;  %s771_s4 = smov 8  }
  0x1e   : > { %563 = dma.hbm_to_vmem [thread:$0]  (!%p859_p11), %s980_s1, 2048, %s171_s26, [#allocation7], %s770_s30, %s770_s30, %s771_s4  }
  0x1f   : > { %p37_p6 = scmp.ge.s32.totalorder %s35_s28, 2  ;;  %s48_s7 = sadd.s32 1, %s755_s14 }
  0x20   : > { %p55_p4 = scmp.ne.s32.totalorder %s755_s14, %s751_s13  ;;  %p56_p9 = scmp.eq.s32.totalorder %s767_s17, 0 }
  0x21   : > { %s1002_s28 = smov (%p37_p6, %s35_s28), 0  ;;  %p573_p0 = scmp.lt.s32.totalorder %s767_s17, 2 }
  0x22   : > { %p877_p12 = por %p56_p9, %p55_p4  ;;  %p883_p13 = por %p834_p2, %p55_p4 }
  0x23   : > { %s43_s10 = ssub.s32 %s763_s16, %s1002_s28  ;;  %s190_s11 = sand.u32 1, %s755_s14  }
  0x24   : > { %p46_p11 = scmp.eq.s32.totalorder %s43_s10, 0  ;;  %s489_s18 = sshll.u32 %s190_s11, 3 }
  0x25   : > { %s490_s25 = sshll.u32 %s763_s16, 7  ;;  %s194_s30 = scalar_lea.vmem [#allocation3], %s489_s18 }
  0x26   : > { %s892_s19 = scalar_select %p46_p11, %s755_s14, %s48_s7  }
  0x27   : > { %s200_s29 = scalar_lea.hbm %s979_s0, %s490_s25  ;;  %s202_s4 = sshll.u32 %s194_s30, 4  ;;  %s203_s4 = int_to_ptr.vmem [resolvable:$true] %s202_s4 }
  0x28   : > { %p900_p2 = pnand %p573_p0, %p877_p12  ;;  %s191_s5 = scalar_lea.sflag [#allocation4], %s190_s11 }
  0x29   : > { %s668_s6 = scalar_lea.vmem %s203_s4, 128  ;;  %s772_s7 = smov [#allocation3]  }
  0x2a   : > { %p657_p3 = pneg %p900_p2  ;;  %p669_p5 = scmp.ne.s32.totalorder %s203_s4, %s668_s6 }
  0x2b   : > { %s673_s10 = sshll.u32 %s772_s7, 4  ;;  %s674_s10 = int_to_ptr.vmem [resolvable:$false] %s673_s10 }
  0x2c   : > { %p671_p7 = pnand %p669_p5, %p657_p3  ;;  %s675_s25 = scalar_lea.vmem %s674_s10, 256 }
  0x2d   : > { %p676_p4 = scmp.lt.s32.totalorder %s203_s4, %s674_s10  ;;  %p677_p9 = scmp.lt.s32.totalorder %s675_s25, %s668_s6 }
  0x2e   : > { %p672_p6 = pneg %p671_p7 }
  0x2f   : > { %p678_p11 = por %p677_p9, %p676_p4 }
  0x31   : > { %p679_p10 = pnand %p678_p11, %p672_p6 }
  0x33   : > { %682 = shalt.err (!%p679_p10)
}
  0x34   : > { %567 = dma.hbm_to_vmem [thread:$0]  (!%p900_p2), %s200_s29, 128, %s203_s4, %s191_s5  }
  0x35   : > { %211 = sbr.rel (%p850_p8) target bundleno = 302 (0x12e), region = 32  ;;  %s911_s8 = sand.u32 (!%p850_p8), 1, %s751_s13  }
  0x36   : > { %s492_s11 = sshll.u32 (!%p850_p8), %s911_s8, 3  ;;  %s214_s18 = scalar_lea.sflag (!%p850_p8), [#allocation4], %s911_s8 }
  0x37   : > { %s917_s26 = scalar_lea.vmem (!%p850_p8), [#allocation3], %s492_s11  ;;  %p993_p12 = scmp.ne.s32.totalorder (!%p850_p8), %s986_s22, 0 }
  0x3a   : > { %734 = dma.done.wait (%p993_p12), %s214_s18, 128  }
  0x3b   : > { %736 = vsyncadd (%p993_p12), %s214_s18, 4294967168 }
  0x3c   : > { %738 = dma.done.wait (%p830_p1), [#allocation7], 2048  }
  0x3d   : > { %740 = vsyncadd (%p830_p1), [#allocation7], 4294965248  ;;  %v773_v0 = vmov 0.0   ;;  %vm774_vm0 = vmmov 0   ;;  %v273_v1 = vld [vmem:[#allocation6 + $0x78] sm:$0xff]  ;;  %v272_v2 = vld [vmem:[#allocation6 + $0x70] sm:$0xff] }
  0x3e   : > { %517 = vmatprep.subr.mxu0 %v773_v0  ;;  %549 = vmatprep.mubr.msk.f32.mxu0 %vm774_vm0, %v773_v0  ;;  %v271_v3 = vld [vmem:[#allocation6 + $0x68] sm:$0xff]  ;;  %v270_v4 = vld [vmem:[#allocation6 + $0x60] sm:$0xff]  ;;  %v269_v5 = vld [vmem:[#allocation6 + $0x58] sm:$0xff]  ;;  %s497_s24 = sshll.u32 %s759_s15, 7  ;;  %s246_s27 = scalar_lea.vmem [#allocation8], %s492_s11 }
  0x3f   : > { %518 = vmatpush3.msra.mxu0 %v273_v1  ;;  %v268_v6 = vld [vmem:[#allocation6 + $0x50] sm:$0xff]  ;;  %v267_v7 = vld [vmem:[#allocation6 + $0x48] sm:$0xff]  ;;  %v266_v8 = vld [vmem:[#allocation6 + $0x40] sm:$0xff]  ;;  %s374_s29 = sshll.u32 %s246_s27, 4  ;;  %s937_s21 = scalar_lea.hbm %s982_s3, %s497_s24  ;;  %s375_s29 = int_to_ptr.vmem [resolvable:$true] %s374_s29 }
  0x40   : > { %519 = vmatprep.subr.mxu0 %v773_v0  ;;  %v265_v9 = vld [vmem:[#allocation6 + $0x38] sm:$0xff]  ;;  %v264_v10 = vld [vmem:[#allocation6 + $0x30] sm:$0xff]  ;;  %v263_v11 = vld [vmem:[#allocation6 + $0x28] sm:$0xff]  ;;  %s360_s5 = scalar_lea.sflag [#allocation5], %s911_s8  ;;  %s683_s6 = scalar_lea.vmem %s375_s29, 128 }
  0x41   : > { %520 = vmatpush3.msra.mxu0 %v272_v2  ;;  %v262_v12 = vld [vmem:[#allocation6 + $0x20] sm:$0xff]  ;;  %v261_v13 = vld [vmem:[#allocation6 + $0x18] sm:$0xff]  ;;  %v260_v14 = vld [vmem:[#allocation6 + $0x10] sm:$0xff]  ;;  %p684_p1 = scmp.ne.s32.totalorder %s375_s29, %s683_s6  ;;  %s775_s15 = smov [#allocation8]  }
  0x42   : > { %521 = vmatprep.subr.mxu0 %v773_v0  ;;  %v259_v15 = vld [vmem:[#allocation6 + $0x8] sm:$0xff]  ;;  %v258_v16 = vld [vmem:[#allocation6] sm:$0xff]  ;;  %v257_v17 = vld [vmem:[%s917_s26] sm:$0xff]  ;;  %s687_s7 = sshll.u32 %s775_s15, 4  ;;  %s688_s7 = int_to_ptr.vmem [resolvable:$false] %s687_s7 }
  0x43   : > { %522 = vmatpush3.msra.mxu0 %v271_v3  ;;  %v495_v18 = vld [vmem:[%s981_s2] ss:$0 sm:$0xff]  ;;  %p685_p8 = pnand %p684_p1, %p883_p13  ;;  %s689_s10 = scalar_lea.vmem %s688_s7, 256 }
  0x44   : > { %523 = vmatprep.subr.mxu0 %v773_v0  ;;  %p690_p0 = scmp.lt.s32.totalorder %s375_s29, %s688_s7  ;;  %p691_p2 = scmp.lt.s32.totalorder %s689_s10, %s683_s6 }
  0x45   : > { %524 = vmatpush3.msra.mxu0 %v270_v4  ;;  %p686_p10 = pneg %p685_p8 }
  0x46   : > { %525 = vmatprep.subr.mxu0 %v773_v0  ;;  %p692_p3 = por %p691_p2, %p690_p0 }
  0x47   : > { %526 = vmatpush3.msra.mxu0 %v269_v5 }
  0x48   : > { %527 = vmatprep.subr.mxu0 %v773_v0  ;;  %p693_p5 = pnand %p692_p3, %p686_p10 }
  0x49   : > { %528 = vmatpush3.msra.mxu0 %v268_v6 }
  0x4a   : > { %529 = vmatprep.subr.mxu0 %v773_v0 }
  0x4b   : > { %530 = vmatpush3.msra.mxu0 %v267_v7 }
  0x4c   : > { %531 = vmatprep.subr.mxu0 %v773_v0 }
  0x4d   : > { %532 = vmatpush3.msra.mxu0 %v266_v8 }
  0x4e   : > { %533 = vmatprep.subr.mxu0 %v773_v0 }
  0x4f   : > { %534 = vmatpush3.msra.mxu0 %v265_v9 }
  0x50   : > { %535 = vmatprep.subr.mxu0 %v773_v0 }
  0x51   : > { %536 = vmatpush3.msra.mxu0 %v264_v10 }
  0x52   : > { %537 = vmatprep.subr.mxu0 %v773_v0 }
  0x53   : > { %538 = vmatpush3.msra.mxu0 %v263_v11 }
  0x54   : > { %539 = vmatprep.subr.mxu0 %v773_v0 }
  0x55   : > { %540 = vmatpush3.msra.mxu0 %v262_v12 }
  0x56   : > { %541 = vmatprep.subr.mxu0 %v773_v0 }
  0x57   : > { %542 = vmatpush3.msra.mxu0 %v261_v13 }
  0x58   : > { %543 = vmatprep.subr.mxu0 %v773_v0 }
  0x59   : > { %544 = vmatpush3.msra.mxu0 %v260_v14 }
  0x5a   : > { %545 = vmatprep.subr.mxu0 %v773_v0 }
  0x5b   : > { %546 = vmatpush3.msra.mxu0 %v259_v15 }
  0x5c   : > { %547 = vmatprep.subr.mxu0 %v773_v0 }
  0x5d   : > { %548 = vmatpush3.msra.mxu0 %v258_v16 }
  0x5e   : > { %550 = vmatmul.mubr.f32.vlgmr.msra.gmra.mxu0 %v257_v17 }
 0x11e   : > { %v340_v19 = vpop.f32.mrf.mxu0 }
 0x11f   : > { %v357_v20 = vadd.f32 %v495_v18, %v340_v19 }
 0x120   : > { %v551_v21 = vpop.f32.mrf.mxu0 }
 0x121   : > { %358 = vst [vmem:[%s246_s27] sm:$0xff] %v357_v20 }
 0x122   : > { %696 = shalt.err (!%p693_p5)
}
 0x123   : > { %s697_s25 = scalar_lea.hbm %s937_s21, 128  ;;  %s701_s18 = scalar_lea.hbm %s982_s3, 256 }
 0x124   : > { %p698_p7 = scmp.ne.s32.totalorder %s937_s21, %s697_s25  ;;  %p702_p9 = scmp.lt.s32.totalorder %s937_s21, %s982_s3 }
 0x125   : > { %p703_p11 = scmp.lt.s32.totalorder %s701_s18, %s697_s25 }
 0x126   : > { %p699_p6 = pnand %p698_p7, %p883_p13 }
 0x127   : > { %p704_p12 = por %p703_p11, %p702_p9 }
 0x128   : > { %p700_p4 = pneg %p699_p6 }
 0x12a   : > { %p705_p1 = pnand %p704_p12, %p700_p4 }
 0x12c   : > { %708 = shalt.err (!%p705_p1)
}
 0x12d   : > { %558 = dma.vmem_to_hbm [thread:$0]  (%p883_p13), %s375_s29, 128, %s937_s21, %s360_s5  }
 0x12e PF: > { %s386_s22 = sand.u32 1, %s747_s12   ;;  %p994_p8 = scmp.ne.s32.totalorder %s987_s23, 0 }
 0x12f   : > { %p995_p10 = scmp.ge.s32.totalorder %s767_s17, 2  ;;  %s387_s24 = scalar_lea.sflag [#allocation5], %s386_s22 }
 0x131   : > { %p569_p0 = pnand %p995_p10, %p994_p8 }
 0x133   : > { %p570_p2 = pneg %p569_p0 }
 0x135   : > { %742 = dma.done.wait (%p570_p2), %s387_s24, 128  }
 0x136   : > { %744 = vsyncadd (%p570_p2), %s387_s24, 4294967168  ;;  %s20_s17 = sadd.s32 1, %s767_s17   ;;  %s996_s12 = smov %s751_s13 }
 0x137   : > { %p17_p3 = scmp.ge.s32.totalorder %s20_s17, 4   ;;  %s997_s13 = smov %s755_s14 }
 0x138   : > { %s998_s14 = smov %s892_s19  ;;  %s999_s15 = smov %s763_s16 }
 0x139   : > { %s1000_s16 = smov %s1002_s28  ;;  %19 = sbr.rel (!%p17_p3) target bundleno = 7 (0x7), region = 93 }
 0x13e   :  { %392 = vsyncpa [#allocation4], 1 }
 0x13f   :  { %394 = vsyncpa [#allocation4 + $0x1], 1 }
 0x140   :  { %395 = vsyncpa [#allocation7], 1 }
 0x141   :  { %396 = vsyncpa [#allocation5], 1 }
 0x142   :  { %398 = vsyncpa [#allocation5 + $0x1], 1 }

</bundles_post_ra>
